<compile_context>
chip_gen: v6e
topology: v6e:2x2x1
jax: 0.10.0
libtpu: 0.0.40
codegen_flags: <defaults>
</compile_context>

<pallas_src>
import jax
import jax.numpy as jnp
from jax.experimental import pallas as pl
from jax.experimental.pallas import tpu as pltpu

_ALIGN = 16                       # sublane alignment safe for f32 (8) and bf16 (16)
_LANES = 128                      # vreg lane width
_VMEM_LIMIT_BYTES = 32 * 1024 * 1024


def _round_up(a, b):
    return ((a + b - 1) // b) * b


def _cdiv(a, b):
    return -(-a // b)


def _pick_row_tile(rows_needed, cap_rows):
    """Largest row tile <= cap_rows (multiple of _ALIGN).  When there are
    enough rows, keep the grid at >= 2 steps so v7x's second TensorCore gets
    work via dimension_semantics=("parallel",)."""
    rows_needed = max(rows_needed, 1)
    if rows_needed >= 2 * _ALIGN:
        split = _round_up(_cdiv(rows_needed, 2), _ALIGN)
    else:
        split = _round_up(rows_needed, _ALIGN)
    return max(_ALIGN, min(cap_rows, split))


# --------------------------------------------------------------------------- #
# Kernels
# --------------------------------------------------------------------------- #
def _pos_emb_wide_kernel(x_ref, f_ref, b_ref, out_ref):
    """Wide path (C >= 128, or C < 128 with 128 % C != 0).

    phase = x * [freqs, freqs] + [0 ... 0, -pi/2 ... -pi/2]
    out   = cos(phase)            (sin(t) == cos(t - pi/2))
    One transcendental per element, one full-width store (unmasked when
    C % 128 == 0).
    """
    x = x_ref[...].astype(jnp.float32)                       # (T, 1)  f32 math
    phase = x * f_ref[...] + b_ref[...]                      # (T, C)  VPU broadcast
    out_ref[...] = jnp.cos(phase).astype(out_ref.dtype)


def _make_dense_kernel(k, tile_r, out_channels):
    """Dense path (C < 128, 128 % C == 0): k = 128 // C logical rows are packed
    per 128-lane physical row so the transcendental runs on fully dense vregs.

      * lane replication x -> x_rep is a tiny 0/1 matmul on the (idle) MXU;
        x is split hi/lo around bf16 so the result is f32-exact regardless of
        the MXU's internal operand precision (the 0/1 matrix is bf16-exact).
      * phase = x_rep * base + bias is 2 VPU ops / element (well under the
        4 VALU slots), so the kernel stays transcendental-bound.
      * the packed tile is de-packed in VMEM with k contiguous row-block
        stores -> the kernel output is already (N, C); no post-kernel HBM
        relayout.  The (masked, C<128-lane) stores hide under the cos work.
    """
    def kernel(x_ref, sel_ref, base_ref, bias_ref, out_ref):
        x = x_ref[...].astype(jnp.float32)                   # (T, k)
        x_hi = x.astype(jnp.bfloat16).astype(jnp.float32)    # bf16-exact part
        x_lo = x - x_hi                                      # residual
        sel = sel_ref[...]                                   # (k, 128) of {0,1}
        x_rep = (jnp.dot(x_hi, sel, preferred_element_type=jnp.float32)
                 + jnp.dot(x_lo, sel, preferred_element_type=jnp.float32))
        phase = x_rep * base_ref[...] + bias_ref[...]        # (T, 128) f32
        vals = jnp.cos(phase)                                # 1 transcendental/elem
        for j in range(k):                                   # static unroll
            out_ref[j * tile_r:(j + 1) * tile_r, :] = (
                vals[:, j * out_channels:(j + 1) * out_channels]
                .astype(out_ref.dtype))
    return kernel


# --------------------------------------------------------------------------- #
# Wrapper
# --------------------------------------------------------------------------- #
def positional_embedding(x, num_channels, max_positions=10000, endpoint=False):
    """Pallas TPU implementation of PositionalEmbedding.forward."""
    assert x.ndim == 1, "torch .ger() requires a 1-D input"
    half = num_channels // 2
    assert half >= 1, "num_channels must be >= 2"
    out_channels = 2 * half                   # matches torch exactly (odd C too)
    n = int(x.shape[0])
    out_dtype = x.dtype
    itemsize = jnp.dtype(out_dtype).itemsize

    # Parameter-free module: freqs derived deterministically, kept in f32
    # (do NOT downcast to x.dtype -- phase accuracy for bf16 inputs).
    # endpoint=True with half==1 divides by zero, same NaN behavior as torch.
    freqs = jnp.arange(half, dtype=jnp.float32)
    freqs = freqs / (half - (1 if endpoint else 0))
    freqs = (1.0 / max_positions) ** freqs
    f_full = jnp.concatenate([freqs, freqs])                              # (C,)
    bias = jnp.where(jnp.arange(out_channels) >= half,
                     -jnp.pi / 2, 0.0).astype(jnp.float32)                # (C,)

    use_dense = (out_channels < _LANES) and (_LANES % out_channels == 0)
    # TODO(synk): extend the packed path to C<128 widths with 128 % C != 0 by
    # packing into lcm(C, 128) lanes; those widths currently take the
    # (lane-padded) wide path below.

    # ---------------- dense packed path: C < 128, 128 % C == 0 -------------
    if use_dense:
        k = _LANES // out_channels            # logical rows per physical row
        r_needed = _cdiv(n, k)
        tile_r = _pick_row_tile(r_needed, 2048)   # 2048x128 f32 packed = 1 MiB
        r_pad = _round_up(max(r_needed, 1), tile_r)
        num_tiles = r_pad // tile_r
        n_pad = r_pad * k

        # Pack so that, within grid tile i, lane-group j of physical row r
        # holds logical row  i*tile_r*k + j*tile_r + r .  The in-kernel
        # de-pack is then k contiguous row-block stores.  x is tiny, so this
        # wrapper-side relayout is negligible (unlike relaying out the output).
        x_p = (jnp.pad(x, (0, n_pad - n))
               .reshape(num_tiles, k, tile_r)
               .transpose(0, 2, 1)
               .reshape(r_pad, k))

        group = jnp.arange(_LANES) // out_channels                        # (128,)
        sel = (group[None, :] == jnp.arange(k)[:, None]).astype(jnp.float32)
        base_row = jnp.tile(f_full, k)[None, :]                           # (1, 128)
        bias_row = jnp.tile(bias, k)[None, :]                             # (1, 128)

        cost = pl.CostEstimate(
            flops=2 * (2 * r_pad * k * _LANES) + 3 * r_pad * _LANES,
            transcendentals=r_pad * _LANES,
            bytes_accessed=(r_pad * k * itemsize + (k + 2) * _LANES * 4
                            + n_pad * out_channels * itemsize),
        )

        out = pl.pallas_call(
            _make_dense_kernel(k, tile_r, out_channels),
            out_shape=jax.ShapeDtypeStruct((n_pad, out_channels), out_dtype),
            grid=(num_tiles,),
            in_specs=[
                pl.BlockSpec((tile_r, k), lambda i: (i, 0)),
                pl.BlockSpec((k, _LANES), lambda i: (0, 0)),
                pl.BlockSpec((1, _LANES), lambda i: (0, 0)),
                pl.BlockSpec((1, _LANES), lambda i: (0, 0)),
            ],
            out_specs=pl.BlockSpec((tile_r * k, out_channels), lambda i: (i, 0)),
            compiler_params=pltpu.CompilerParams(
                dimension_semantics=("parallel",),
                vmem_limit_bytes=_VMEM_LIMIT_BYTES),
            cost_estimate=cost,
        )(x_p, sel, base_row, bias_row)
        return out[:n]                         # output is already (n_pad, C)

    # ---------------- wide path: C >= 128 (already lane-dense) -------------
    budget = 4 * 1024 * 1024                  # bytes per output block (f32)
    cap = max(_ALIGN,
              min(4096, (budget // max(out_channels * 4, 1)) // _ALIGN * _ALIGN))
    tile_n = _pick_row_tile(n, cap)
    n_pad = _round_up(max(n, 1), tile_n)

    x_p = jnp.pad(x, (0, n_pad - n)).reshape(n_pad, 1)
    f_row = f_full.reshape(1, out_channels)
    b_row = bias.reshape(1, out_channels)

    cost = pl.CostEstimate(
        flops=2 * n_pad * out_channels,
        transcendentals=n_pad * out_channels,
        bytes_accessed=(n_pad * itemsize + 2 * out_channels * 4
                        + n_pad * out_channels * itemsize),
    )

    out = pl.pallas_call(
        _pos_emb_wide_kernel,
        out_shape=jax.ShapeDtypeStruct((n_pad, out_channels), out_dtype),
        grid=(n_pad // tile_n,),
        in_specs=[
            pl.BlockSpec((tile_n, 1), lambda i: (i, 0)),
            pl.BlockSpec((1, out_channels), lambda i: (0, 0)),
            pl.BlockSpec((1, out_channels), lambda i: (0, 0)),
        ],
        out_specs=pl.BlockSpec((tile_n, out_channels), lambda i: (i, 0)),
        compiler_params=pltpu.CompilerParams(
            dimension_semantics=("parallel",),
            vmem_limit_bytes=_VMEM_LIMIT_BYTES),
        cost_estimate=cost,
    )(x_p, f_row, b_row)
    return out[:n]


# --------------------------------------------------------------------------- #
# Reference + test
# --------------------------------------------------------------------------- #
def _reference(x, num_channels, max_positions=10000, endpoint=False):
    half = num_channels // 2
    freqs = jnp.arange(half, dtype=jnp.float32)
    freqs = freqs / (half - (1 if endpoint else 0))
    freqs = (1.0 / max_positions) ** freqs
    xf = jnp.outer(x.astype(jnp.float32), freqs)
    return jnp.concatenate([jnp.cos(xf), jnp.sin(xf)], axis=1).astype(x.dtype)


def _check(out, ref, shape, tag):
    assert out.shape == shape, (tag, out.shape, shape)
    err = float(jnp.max(jnp.abs(out.astype(jnp.float32) - ref.astype(jnp.float32))))
    assert jnp.allclose(out, ref, atol=1e-4, rtol=1e-4), (tag, err)


if __name__ == "__main__":
    key = jax.random.PRNGKey(0)

    # Case 1: C=32 (< 128) -> packed MXU/transcendental path (k=4); N=10 is not
    # a multiple of the packing factor -> exercises padding + in-kernel de-pack.
    n1, c1 = 10, 32
    x1 = jax.random.normal(key, (n1,), dtype=jnp.float32) * 4.0
    out1 = jax.block_until_ready(positional_embedding(x1, c1))
    _check(out1, _reference(x1, c1), (n1, c1), "dense C=32")

    # Case 2: C=192 (>= 128, not a multiple of 128) -> wide fused-cos path,
    # grid split into 2 steps.
    n2, c2 = 50, 192
    x2 = jax.random.normal(jax.random.fold_in(key, 1), (n2,), dtype=jnp.float32) * 4.0
    out2 = jax.block_until_ready(positional_embedding(x2, c2))
    _check(out2, _reference(x2, c2), (n2, c2), "wide C=192")

    # Case 3: C=16 (k=8), N=600 with endpoint=True -> multi-tile dense grid
    # (2 steps) + cross-tile packing order + endpoint flag.
    n3, c3 = 600, 16
    x3 = jax.random.normal(jax.random.fold_in(key, 2), (n3,), dtype=jnp.float32) * 4.0
    out3 = jax.block_until_ready(positional_embedding(x3, c3, endpoint=True))
    _check(out3, _reference(x3, c3, endpoint=True), (n3, c3), "dense C=16")

    print("KERNEL_OK")
</pallas_src>

<mosaic_0001>
module attributes {stable_mosaic.version = 11 : i64} {
  func.func @kernel(%arg0: i32, %arg1: memref<16x4xf32, #tpu.memory_space<vmem>>, %arg2: memref<4x128xf32, #tpu.memory_space<vmem>>, %arg3: memref<1x128xf32, #tpu.memory_space<vmem>>, %arg4: memref<1x128xf32, #tpu.memory_space<vmem>>, %arg5: memref<64x32xf32, #tpu.memory_space<vmem>>) attributes {dimension_semantics = [#tpu.dimension_semantics<parallel>], iteration_bounds = array<i64: 1>, scalar_prefetch = 0 : i64, scratch_operands = 0 : i64, tpu.core_type = #tpu.core_type<tc>, window_params = [{transform_indices = @transform_0, window_bounds = array<i64: 16, 4>}, {pipeline_mode = #tpu.pipeline_mode<synchronous>, transform_indices = @transform_1, window_bounds = array<i64: 4, 128>}, {pipeline_mode = #tpu.pipeline_mode<synchronous>, transform_indices = @transform_2, window_bounds = array<i64: 1, 128>}, {pipeline_mode = #tpu.pipeline_mode<synchronous>, transform_indices = @transform_3, window_bounds = array<i64: 1, 128>}, {transform_indices = @transform_4, window_bounds = array<i64: 64, 32>}]} {
    %c0 = arith.constant 0 : index
    %c0_0 = arith.constant 0 : index
    %0 = vector.load %arg1[%c0, %c0_0] : memref<16x4xf32, #tpu.memory_space<vmem>>, vector<16x4xf32>
    %1 = arith.truncf %0 : vector<16x4xf32> to vector<16x4xbf16>
    %2 = arith.extf %1 : vector<16x4xbf16> to vector<16x4xf32>
    %3 = arith.subf %0, %2 : vector<16x4xf32>
    %c0_1 = arith.constant 0 : index
    %c0_2 = arith.constant 0 : index
    %4 = vector.load %arg2[%c0_1, %c0_2] : memref<4x128xf32, #tpu.memory_space<vmem>>, vector<4x128xf32>
    %cst = arith.constant dense<0.000000e+00> : vector<16x128xf32>
    %5 = tpu.matmul %2, %4, %cst {dimension_numbers = #tpu.dot_dimension_numbers<[1], [0], [0], [1], [0, 0, 1, 1], [], []>} : vector<16x4xf32>, vector<4x128xf32>, vector<16x128xf32> -> vector<16x128xf32>
    %cst_3 = arith.constant dense<0.000000e+00> : vector<16x128xf32>
    %6 = tpu.matmul %3, %4, %cst_3 {dimension_numbers = #tpu.dot_dimension_numbers<[1], [0], [0], [1], [0, 0, 1, 1], [], []>} : vector<16x4xf32>, vector<4x128xf32>, vector<16x128xf32> -> vector<16x128xf32>
    %7 = arith.addf %5, %6 : vector<16x128xf32>
    %c0_4 = arith.constant 0 : index
    %c0_5 = arith.constant 0 : index
    %8 = vector.load %arg3[%c0_4, %c0_5] : memref<1x128xf32, #tpu.memory_space<vmem>>, vector<1x128xf32>
    %9 = vector.broadcast %8 : vector<1x128xf32> to vector<16x128xf32>
    %10 = arith.mulf %7, %9 : vector<16x128xf32>
    %c0_6 = arith.constant 0 : index
    %c0_7 = arith.constant 0 : index
    %11 = vector.load %arg4[%c0_6, %c0_7] : memref<1x128xf32, #tpu.memory_space<vmem>>, vector<1x128xf32>
    %12 = vector.broadcast %11 : vector<1x128xf32> to vector<16x128xf32>
    %13 = arith.addf %10, %12 : vector<16x128xf32>
    %14 = math.cos %13 : vector<16x128xf32>
    %15 = vector.extract_strided_slice %14 {offsets = [0, 0], sizes = [16, 32], strides = [1, 1]} : vector<16x128xf32> to vector<16x32xf32>
    %c0_8 = arith.constant 0 : index
    %c0_9 = arith.constant 0 : index
    %16 = vector.load %arg5[%c0_8, %c0_9] : memref<64x32xf32, #tpu.memory_space<vmem>>, vector<16x32xf32>
    tpu.vector_store %arg5[%c0_8, %c0_9], %15 {strides = array<i32>} : memref<64x32xf32, #tpu.memory_space<vmem>>, vector<16x32xf32>,
    %17 = vector.extract_strided_slice %14 {offsets = [0, 32], sizes = [16, 32], strides = [1, 1]} : vector<16x128xf32> to vector<16x32xf32>
    %c16 = arith.constant 16 : index
    %c0_10 = arith.constant 0 : index
    %18 = vector.load %arg5[%c16, %c0_10] : memref<64x32xf32, #tpu.memory_space<vmem>>, vector<16x32xf32>
    tpu.vector_store %arg5[%c16, %c0_10], %17 {strides = array<i32>} : memref<64x32xf32, #tpu.memory_space<vmem>>, vector<16x32xf32>,
    %19 = vector.extract_strided_slice %14 {offsets = [0, 64], sizes = [16, 32], strides = [1, 1]} : vector<16x128xf32> to vector<16x32xf32>
    %c32 = arith.constant 32 : index
    %c0_11 = arith.constant 0 : index
    %20 = vector.load %arg5[%c32, %c0_11] : memref<64x32xf32, #tpu.memory_space<vmem>>, vector<16x32xf32>
    tpu.vector_store %arg5[%c32, %c0_11], %19 {strides = array<i32>} : memref<64x32xf32, #tpu.memory_space<vmem>>, vector<16x32xf32>,
    %21 = vector.extract_strided_slice %14 {offsets = [0, 96], sizes = [16, 32], strides = [1, 1]} : vector<16x128xf32> to vector<16x32xf32>
    %c48 = arith.constant 48 : index
    %c0_12 = arith.constant 0 : index
    %22 = vector.load %arg5[%c48, %c0_12] : memref<64x32xf32, #tpu.memory_space<vmem>>, vector<16x32xf32>
    tpu.vector_store %arg5[%c48, %c0_12], %21 {strides = array<i32>} : memref<64x32xf32, #tpu.memory_space<vmem>>, vector<16x32xf32>,
    return
  }
  func.func @transform_0(%arg0: i32) -> (i32, i32) {
    %c0_i32 = arith.constant 0 : i32
    %c0_i32_0 = arith.constant 0 : i32
    return %arg0, %c0_i32 : i32, i32
  }
  func.func @transform_1(%arg0: i32) -> (i32, i32) {
    %c0_i32 = arith.constant 0 : i32
    %c0_i32_0 = arith.constant 0 : i32
    %c0_i32_1 = arith.constant 0 : i32
    return %c0_i32, %c0_i32_0 : i32, i32
  }
  func.func @transform_2(%arg0: i32) -> (i32, i32) {
    %c0_i32 = arith.constant 0 : i32
    %c0_i32_0 = arith.constant 0 : i32
    %c0_i32_1 = arith.constant 0 : i32
    return %c0_i32, %c0_i32_0 : i32, i32
  }
  func.func @transform_3(%arg0: i32) -> (i32, i32) {
    %c0_i32 = arith.constant 0 : i32
    %c0_i32_0 = arith.constant 0 : i32
    %c0_i32_1 = arith.constant 0 : i32
    return %c0_i32, %c0_i32_0 : i32, i32
  }
  func.func @transform_4(%arg0: i32) -> (i32, i32) {
    %c0_i32 = arith.constant 0 : i32
    %c0_i32_0 = arith.constant 0 : i32
    return %arg0, %c0_i32 : i32, i32
  }
}

</mosaic_0001>

<bundles_post_ra>
// kernel: tpu_custom_call.1
= control target key start
LH: loop header
LB: loop body
LE: loop exit
PB: predicated region body
PF: predicated region fallthrough
CT: control target
= control target key end

     0   :  { %vm32_vm0 = vcmask 1043456   ;;  %vm25_vm1 = vcmask 31744   ;;  %v506_v40 = vmov 683565275   ;;  %v507_v42 = vmov 2475754826   ;;  %s665_s1 = inlined_call_operand.vmem [shape: f32[4,128], index: 1, kind: input, shape index: {}]   ;;  %s666_s0 = inlined_call_operand.vmem [shape: f32[16,4], index: 0, kind: input, shape index: {}]   ;;  %s667_s2 = inlined_call_operand.vmem [shape: f32[1,128], index: 2, kind: input, shape index: {}]   ;;  %s668_s3 = inlined_call_operand.vmem [shape: f32[1,128], index: 3, kind: input, shape index: {}]   ;;  %s669_s4 = inlined_call_operand.vmem [shape: f32[64,32], index: 4, kind: output, shape index: {}]  }
   0x1   :  { %v24_v0 = vld [vmem:[%s665_s1] sm:$0xf]  ;;  %v18_v2 = vld [vmem:[%s666_s0 + $0x8] sm:$0xff]  ;;  %v508_v44 = vmov 2131351028   ;;  %s513_s24 = smov 96  }
   0x2   :  { %v17_v1 = vld [vmem:[%s666_s0] sm:$0xff]  ;;  %476 = vmatprep.subr.msk.mxu1 %vm32_vm0, %v24_v0  ;;  %471 = vmatprep.subr.msk.mxu0 %vm32_vm0, %v24_v0  ;;  %v509_v49 = vmov 2102212464   ;;  %v510_v51 = vmov 920167782   ;;  %s514_s27 = smov 32  }
   0x3   :  { %v19_v3 = vpack.c.bf16 %v18_v2, %v17_v1  ;;  %477 = vmatpush3.msk.msra.mxu1 %vm32_vm0, %v24_v0  ;;  %472 = vmatpush3.msk.msra.mxu0 %vm32_vm0, %v24_v0  ;;  %v455_v10 = vld [vmem:[%s667_s2] ss:$0 sm:$0xff]  ;;  %v511_v56 = vmov 1326507024   ;;  %s512_s2 = smov 64  }
   0x4   :  { %v456_v12 = vld [vmem:[%s668_s3] ss:$0 sm:$0xff] }
   0x5   :  { %v20_v4 = vunpack.c.l.bf16 %v19_v3  ;;  %v21_v5 = vunpack.c.h.bf16 %v19_v3 }
   0x7   :  { %v23_v6 = vsub.f32 %v18_v2, %v21_v5  ;;  %478 = vmatprep.mubr.msk.f32.mxu1 %vm25_vm1, %v20_v4  ;;  %v22_v7 = vsub.f32 %v17_v1, %v20_v4 }
   0x8   :  { %479 = vmatmul.mubr.msk.f32.vlgmr.msra.gmra.mxu1 %vm25_vm1, %v21_v5 }
   0x9   :  { %473 = vmatprep.mubr.msk.f32.mxu0 %vm25_vm1, %v22_v7 }
   0xa   :  { %474 = vmatmul.mubr.msk.f32.vlgmr.msra.gmra.mxu0 %vm25_vm1, %v23_v6 }
  0xc8   :  { %v480_v8 = vpop.f32.mrf.mxu1 }
  0xca   :  { %v475_v9 = vpop.f32.mrf.mxu0  ;;  %v183_v13 = vpop.f32.mrf.mxu1 }
  0xcb   :  { %v189_v11 = vadd.f32 %v480_v8, %v475_v9 }
  0xcc   :  { %v102_v14 = vpop.f32.mrf.mxu0 }
  0xcd   :  { %v200_v15 = vmul.f32 %v455_v10, %v189_v11  ;;  %v184_v16 = vadd.f32 %v183_v13, %v102_v14 }
  0xcf   :  { %v555_v17 = vadd.f32 %v456_v12, %v200_v15  ;;  %v199_v18 = vmul.f32 %v455_v10, %v184_v16 }
  0xd1   :  { %v316_v19 = vand.u32 2139095040, %v555_v17  ;;  %v558_v20 = vadd.f32 %v456_v12, %v199_v18  ;;  %v313_v21 = vand.u32 2147483647, %v555_v17  ;;  %vm315_vm0 = vcmp.lt.s32.totalorder %v555_v17, 0 }
  0xd3   :  { %v317_v22 = vshrl.u32 %v316_v19, 23  ;;  %v213_v23 = vand.u32 2139095040, %v558_v20  ;;  %v320_v26 = vand.u32 8388607, %v313_v21  ;;  %v210_v27 = vand.u32 2147483647, %v558_v20 }
  0xd4   :  { %vm608_vm1 = vcmp.le.f32.partialorder %v313_v21, 0.7853982 }
  0xd5   :  { %v461_v24 = vadd.s32 4294967169, %v317_v22  ;;  %v214_v25 = vshrl.u32 %v213_v23, 23  ;;  %v321_v31 = vor.u32 8388608, %v320_v26  ;;  %v217_v33 = vand.u32 8388607, %v210_v27 }
  0xd7   :  { %v323_v28 = vadd.s32 1, %v461_v24  ;;  %v457_v29 = vadd.s32 4294967169, %v214_v25  ;;  %v567_v39 = vshll.u32 %v321_v31, 8  ;;  %v218_v46 = vor.u32 8388608, %v217_v33 }
  0xd9   :  { %vm324_vm2 = vcmp.gt.s32.totalorder %v323_v28, 0  ;;  %v220_v30 = vadd.s32 1, %v457_v29  ;;  %v258_v13 = vshll.u32 %v218_v46, 8 }
  0xda   :  { %v325_v32 = vsel %vm324_vm2, %v323_v28, 0  ;;  %vm212_vm2 = vcmp.lt.s32.totalorder %v558_v20, 0 }
  0xdb   :  { %v327_v34 = vand.u32 31, %v325_v32  ;;  %vm221_vm3 = vcmp.gt.s32.totalorder %v220_v30, 0  ;;  %v326_v36 = vshrl.u32 %v325_v32, 5 }
  0xdc   :  { %v222_v35 = vsel %vm221_vm3, %v220_v30, 0  ;;  %vm620_vm3 = vcmp.le.f32.partialorder %v210_v27, 0.7853982 }
  0xdd   :  { %v328_v37 = vsub.s32 32, %v327_v34  ;;  %v224_v38 = vand.u32 31, %v222_v35  ;;  %v330_v41 = vshll.u32 %v506_v40, %v327_v34  ;;  %v333_v43 = vshll.u32 %v507_v42, %v327_v34 }
  0xde   :  { %v336_v45 = vshll.u32 %v508_v44, %v327_v34  ;;  %v339_v50 = vshll.u32 %v509_v49, %v327_v34  ;;  %v342_v52 = vshll.u32 %v510_v51, %v327_v34  ;;  %vm345_vm4 = vcmp.lt.s32.totalorder %v326_v36, 1 }
  0xdf   :  { %v331_v47 = vshrl.u32 %v507_v42, %v328_v37  ;;  %v334_v48 = vshrl.u32 %v508_v44, %v328_v37  ;;  %v225_v53 = vsub.s32 32, %v224_v38  ;;  %v337_v54 = vshrl.u32 %v509_v49, %v328_v37 }
  0xe0   :  { %v340_v55 = vshrl.u32 %v510_v51, %v328_v37  ;;  %v343_v57 = vshrl.u32 %v511_v56, %v328_v37  ;;  %v329_v58 = vshrl.u32 %v506_v40, %v328_v37  ;;  %vm346_vm5 = vcmp.lt.s32.totalorder %v326_v36, 2 }
  0xe1   :  { %v332_v59 = vor.u32 %v331_v47, %v330_v41  ;;  %v335_v60 = vor.u32 %v334_v48, %v333_v43  ;;  %v338_v61 = vor.u32 %v337_v54, %v336_v45  ;;  %vm347_vm6 = vcmp.lt.s32.totalorder %v326_v36, 3 }
  0xe2   :  { %v341_v62 = vor.u32 %v340_v55, %v339_v50  ;;  %v344_v63 = vor.u32 %v343_v57, %v342_v52  ;;  %vm348_vm7 = vcmp.lt.s32.totalorder %v326_v36, 4  ;;  %v228_v9 = vshrl.u32 %v507_v42, %v225_v53 }
  0xe3   :  { %v349_v0 = vsel %vm345_vm4, %v329_v58, %v332_v59  ;;  %v353_v1 = vsel %vm345_vm4, %v332_v59, %v335_v60  ;;  %v350_v2 = vsel %vm348_vm7, %v338_v61, 2102212464  ;;  %v357_v4 = vsel %vm345_vm4, %v335_v60, %v338_v61 }
  0xe4   :  { %v354_v3 = vsel %vm348_vm7, %v341_v62, 920167782  ;;  %v358_v5 = vsel %vm348_vm7, %v344_v63, 1326507024  ;;  %v351_v6 = vsel %vm347_vm6, %v335_v60, %v350_v2  ;;  %v227_v12 = vshll.u32 %v506_v40, %v224_v38 }
  0xe5   :  { %v355_v7 = vsel %vm347_vm6, %v338_v61, %v354_v3  ;;  %v359_v8 = vsel %vm347_vm6, %v341_v62, %v358_v5  ;;  %v223_v19 = vshrl.u32 %v222_v35, 5  ;;  %v352_v22 = vsel %vm346_vm5, %v349_v0, %v351_v6 }
  0xe6   :  { %v356_v10 = vsel %vm346_vm5, %v353_v1, %v355_v7  ;;  %v360_v11 = vsel %vm346_vm5, %v357_v4, %v359_v8  ;;  %v230_v23 = vshll.u32 %v507_v42, %v224_v38  ;;  %v231_v24 = vshrl.u32 %v508_v44, %v225_v53 }
  0xe7   :  { %v575_v14 = vmul.u32.u64.low %v567_v39, %v360_v11  ;;  %v576_v15 = vmul.u32.u64.high %v567_v39, %v360_v11, %v575_v14  ;;  %v579_v16 = vmul.u32.u64.low %v567_v39, %v356_v10  ;;  %v580_v18 = vmul.u32.u64.high %v567_v39, %v356_v10, %v579_v16 }
  0xe8   :  { %v229_v25 = vor.u32 %v228_v9, %v227_v12  ;;  %v233_v26 = vshll.u32 %v508_v44, %v224_v38  ;;  %v234_v28 = vshrl.u32 %v509_v49, %v225_v53  ;;  %v237_v29 = vshrl.u32 %v510_v51, %v225_v53 }
  0xe9   :  { %v232_v30 = vor.u32 %v231_v24, %v230_v23  ;;  %v236_v31 = vshll.u32 %v509_v49, %v224_v38  ;;  %v239_v32 = vshll.u32 %v510_v51, %v224_v38  ;;  %v240_v33 = vshrl.u32 %v511_v56, %v225_v53 }
  0xea   :  { %v368_v34 = vmul.u32 %v567_v39, %v352_v22  ;;  %vm370_vm8 = vc.u32 %v576_v15, %v579_v16  ;;  %v371_v37 = vadd.s32 1, %v580_v18  ;;  %v235_v35 = vor.u32 %v234_v28, %v233_v26 }
  0xeb   :  { %v238_v36 = vor.u32 %v237_v29, %v236_v31  ;;  %v241_v41 = vor.u32 %v240_v33, %v239_v32  ;;  %vm242_vm9 = vcmp.lt.s32.totalorder %v223_v19, 1  ;;  %vm245_vm10 = vcmp.lt.s32.totalorder %v223_v19, 4 }
  0xec   :  { %v372_v42 = vsel %vm370_vm8, %v371_v37, %v580_v18  ;;  %v226_v43 = vshrl.u32 %v506_v40, %v225_v53  ;;  %v247_v44 = vsel %vm245_vm10, %v235_v35, 2102212464  ;;  %v250_v45 = vsel %vm242_vm9, %v229_v25, %v232_v30 }
  0xed   :  { %v373_v38 = vadd.s32 %v372_v42, %v368_v34  ;;  %vm244_vm11 = vcmp.lt.s32.totalorder %v223_v19, 3  ;;  %v251_v46 = vsel %vm245_vm10, %v238_v36, 920167782  ;;  %v254_v39 = vsel %vm242_vm9, %v232_v30, %v235_v35 }
  0xee   :  { %vm243_vm12 = vcmp.lt.s32.totalorder %v223_v19, 2  ;;  %v246_v47 = vsel %vm242_vm9, %v226_v43, %v229_v25  ;;  %v252_v48 = vsel %vm244_vm11, %v235_v35, %v251_v46  ;;  %v255_v49 = vsel %vm245_vm10, %v241_v41, 1326507024 }
  0xef   :  { %v374_v50 = vadd.s32 536870912, %v373_v38  ;;  %v248_v51 = vsel %vm244_vm11, %v232_v30, %v247_v44  ;;  %v253_v52 = vsel %vm243_vm12, %v250_v45, %v252_v48  ;;  %v256_v54 = vsel %vm244_vm11, %v238_v36, %v255_v49 }
  0xf0   :  { %v257_v55 = vsel %vm243_vm12, %v254_v39, %v256_v54  ;;  %v590_v56 = vmul.u32.u64.low %v258_v13, %v253_v52  ;;  %v591_v57 = vmul.u32.u64.high %v258_v13, %v253_v52, %v590_v56  ;;  %v249_v59 = vsel %vm243_vm12, %v246_v47, %v248_v51 }
  0xf1   :  { %v375_v58 = vshrl.u32 %v374_v50, 30  ;;  %v593_v40 = vmul.u32.u64.low %v258_v13, %v257_v55  ;;  %v594_v53 = vmul.u32.u64.high %v258_v13, %v257_v55, %v593_v40  ;;  %v265_v63 = vmul.u32 %v258_v13, %v249_v59 }
  0xf2   :  { %v268_v61 = vadd.s32 1, %v591_v57  ;;  %v369_v11 = vadd.s32 %v579_v16, %v576_v15  ;;  %vm416_vm7 = vcmask 261120   ;;  %vm405_vm8 = vweird.f32 %v555_v17 }
  0xf3   :  { %v376_v60 = vshll.u32 %v375_v58, 30  ;;  %vm267_vm13 = vc.u32 %v594_v53, %v590_v56  ;;  %v266_v34 = vadd.s32 %v590_v56, %v594_v53  ;;  %v399_v46 = vsub.s32 4, %v375_v58 }
  0xf4   :  { %v269_v0 = vsel %vm267_vm13, %v268_v61, %v591_v57  ;;  %vm302_vm12 = vweird.f32 %v558_v20 }
  0xf5   :  { %v377_v62 = vsub.s32 %v373_v38, %v376_v60  ;;  %v270_v2 = vadd.s32 %v269_v0, %v265_v63  ;;  %v400_v49 = vsel %vm315_vm0, %v399_v46, %v375_v58 }
  0xf6   :  { %v402_v21 = vsel %vm608_vm1, 0, %v400_v49 }
  0xf7   :  { %v379_v1 = vsub.s32 0, %v377_v62  ;;  %v271_v4 = vadd.s32 536870912, %v270_v2  ;;  %v406_v56 = vand.u32 3, %v402_v21 }
  0xf9   :  { %v462_v3 = vmin.u32 %v379_v1, %v377_v62  ;;  %v599_v6 = vshrl.u32 %v271_v4, 30  ;;  %vm411_vm4 = vcmp.eq.s32.totalorder %v406_v56, 2  ;;  %vm408_vm5 = vcmp.eq.s32.totalorder %v406_v56, 0 }
  0xfa   :  { %vm407_vm6 = vcmp.lt.s32.totalorder %v406_v56, 2 }
  0xfb   :  { %v381_v5 = vclz %v462_v3  ;;  %v273_v8 = vshll.u32 %v599_v6, 30  ;;  %v296_v57 = vsub.s32 4, %v599_v6 }
  0xfd   :  { %v463_v7 = vadd.s32 4294967294, %v381_v5  ;;  %v274_v10 = vsub.s32 %v270_v2, %v273_v8  ;;  %v297_v60 = vsel %vm212_vm2, %v296_v57, %v599_v6 }
  0xfe   :  { %v299_v0 = vsel %vm620_vm3, 0, %v297_v60 }
  0xff   :  { %vm464_vm14 = vcmp.lt.s32.totalorder %v463_v7, 0  ;;  %v276_v14 = vsub.s32 0, %v274_v10  ;;  %v303_v1 = vand.u32 3, %v299_v0 }
 0x100   :  { %v384_v9 = vsel %vm464_vm14, 0, %v463_v7 }
 0x101   :  { %v385_v12 = vsub.s32 32, %v384_v9  ;;  %v389_v13 = vsub.s32 4294967266, %v384_v9  ;;  %v386_v18 = vshll.u32 %v377_v62, %v384_v9  ;;  %v458_v23 = vmin.u32 %v276_v14, %v274_v10 }
 0x102   :  { %vm308_vm9 = vcmp.eq.s32.totalorder %v303_v1, 2  ;;  %vm305_vm10 = vcmp.eq.s32.totalorder %v303_v1, 0  ;;  %vm304_vm11 = vcmp.lt.s32.totalorder %v303_v1, 2 }
 0x103   :  { %v387_v19 = vshrl.u32 %v369_v11, %v385_v12  ;;  %v390_v22 = vadd.s32 127, %v389_v13  ;;  %v278_v26 = vclz %v458_v23 }
 0x105   :  { %v388_v24 = vor.u32 %v387_v19, %v386_v18  ;;  %v391_v25 = vshll.u32 %v390_v22, 23  ;;  %v459_v29 = vadd.s32 4294967294, %v278_v26 }
 0x107   :  { %v392_v28 = vor.u32 4788187, %v391_v25  ;;  %v395_v31 = vcvt.s32.f32 %v388_v24  ;;  %vm460_vm15 = vcmp.lt.s32.totalorder %v459_v29, 0 }
 0x108   :  { %v281_v33 = vsel %vm460_vm15, 0, %v459_v29 }
 0x109   :  { %v393_v30 = vand.u32 2147483647, %v392_v28  ;;  %v282_v15 = vsub.s32 32, %v281_v33  ;;  %v286_v16 = vsub.s32 4294967266, %v281_v33  ;;  %v283_v35 = vshll.u32 %v274_v10, %v281_v33 }
 0x10b   :  { %v396_v32 = vmul.f32 %v395_v31, %v393_v30  ;;  %v284_v36 = vshrl.u32 %v266_v34, %v282_v15  ;;  %v287_v41 = vadd.s32 127, %v286_v16 }
 0x10d   :  { %v397_v37 = vxor.u32 2147483648, %v396_v32  ;;  %v285_v45 = vor.u32 %v284_v36, %v283_v35  ;;  %v288_v38 = vshll.u32 %v287_v41, 23 }
 0x10f   :  { %v398_v43 = vsel %vm315_vm0, %v397_v37, %v396_v32  ;;  %v289_v39 = vor.u32 4788187, %v288_v38  ;;  %v292_v48 = vcvt.s32.f32 %v285_v45 }
 0x110   :  { %v401_v44 = vsel %vm608_vm1, %v555_v17, %v398_v43 }
 0x111   :  { %498 = vcosq.f32 %v401_v44  ;;  %v290_v47 = vand.u32 2147483647, %v289_v39 }
 0x112   :  { %500 = vsinq.f32 %v401_v44 }
 0x113   :  { %v293_v50 = vmul.f32 %v292_v48, %v290_v47 }
 0x115   :  { %v294_v51 = vxor.u32 2147483648, %v293_v50 }
 0x117   :  { %v295_v54 = vsel %vm212_vm2, %v294_v51, %v293_v50 }
 0x118   :  { %v298_v55 = vsel %vm620_vm3, %v558_v20, %v295_v54 }
 0x119   :  { %502 = vcosq.f32 %v298_v55 }
 0x11a   :  { %504 = vsinq.f32 %v298_v55 }
 0x11e   :  { %v499_v58 = vpop.eup %498 }
 0x11f   :  { %v501_v40 = vpop.eup %500  ;;  %v412_v53 = vxor.u32 2147483648, %v499_v58 }
 0x120   :  { %v409_v59 = vxor.u32 2147483648, %v501_v40 }
 0x121   :  { %v413_v27 = vsel %vm411_vm4, %v412_v53, %v501_v40 }
 0x122   :  { %v410_v61 = vsel %vm408_vm5, %v499_v58, %v409_v59 }
 0x123   :  { %v414_v62 = vsel %vm407_vm6, %v410_v61, %v413_v27 }
 0x124   :  { %v415_v63 = vsel %vm405_vm8, nan, %v414_v62 }
 0x125   :  { %431 = vrot.lane.b32.xlu1 %v415_v63, %s512_s2  ;;  %418 = vst.msk [vmem:[%s669_s4 + $0x8] sm:$0xff] %vm416_vm7, %v415_v63  ;;  %423 = vrot.lane.b32.xlu0 %v415_v63, %s513_s24 }
 0x126   :  { %v503_v2 = vpop.eup %502 }
 0x127   :  { %v505_v3 = vpop.eup %504  ;;  %v309_v4 = vxor.u32 2147483648, %v503_v2 }
 0x128   :  { %v306_v5 = vxor.u32 2147483648, %v505_v3 }
 0x129   :  { %v310_v17 = vsel %vm308_vm9, %v309_v4, %v505_v3 }
 0x12a   :  { %v307_v6 = vsel %vm305_vm10, %v503_v2, %v306_v5 }
 0x12b   :  { %v311_v7 = vsel %vm304_vm11, %v307_v6, %v310_v17 }
 0x12c   :  { %v312_v8 = vsel %vm302_vm12, nan, %v311_v7 }
 0x12d   :  { %429 = vrot.lane.b32.xlu1 %v312_v8, %s512_s2  ;;  %417 = vst.msk [vmem:[%s669_s4] sm:$0xff] %vm416_vm7, %v312_v8  ;;  %421 = vrot.lane.b32.xlu0 %v312_v8, %s513_s24 }
 0x131   :  { %439 = vrot.lane.b32.xlu1 %v415_v63, %s514_s27  ;;  %437 = vrot.lane.b32.xlu0 %v312_v8, %s514_s27 }
 0x197   :  { %v432_v9 = vpop.permute.xlu1 %431  ;;  %v424_v10 = vpop.permute.xlu0 %423 }
 0x198   :  { %436 = vst.msk [vmem:[%s669_s4 + $0x28] sm:$0xff] %vm416_vm7, %v432_v9  ;;  %428 = vst.msk [vmem:[%s669_s4 + $0x18] sm:$0xff] %vm416_vm7, %v424_v10 }
 0x19f   :  { %v430_v20 = vpop.permute.xlu1 %429  ;;  %v422_v11 = vpop.permute.xlu0 %421 }
 0x1a0   :  { %435 = vst.msk [vmem:[%s669_s4 + $0x20] sm:$0xff] %vm416_vm7, %v430_v20  ;;  %427 = vst.msk [vmem:[%s669_s4 + $0x10] sm:$0xff] %vm416_vm7, %v422_v11 }
 0x1a3   :  { %v440_v12 = vpop.permute.xlu1 %439  ;;  %v438_v13 = vpop.permute.xlu0 %437 }
 0x1a4   :  { %444 = vst.msk [vmem:[%s669_s4 + $0x38] sm:$0xff] %vm416_vm7, %v440_v12  ;;  %443 = vst.msk [vmem:[%s669_s4 + $0x30] sm:$0xff] %vm416_vm7, %v438_v13 }

</bundles_post_ra>
